<compile_context>
chip_gen: v7x
topology: tpu7x:2x2x1
jax: 0.10.0
libtpu: 0.0.40
codegen_flags: <defaults>
</compile_context>

<pallas_src>
import functools

import jax
import jax.numpy as jnp
from jax.experimental import pallas as pl
from jax.experimental.pallas import tpu as pltpu


def _round_up(x: int, m: int) -> int:
    return (x + m - 1) // m * m


def _patch_embed_kernel(x_ref, w_ref, b_ref, o_ref):
    # x_ref: (TM, K_pad)   patch vectors, (c, ph, pw)-major (matches Conv2d)
    # w_ref: (K_pad, TE)   projection weight tile (grid-invariant on main path)
    # b_ref: (1, TE)       bias tile (f32)
    # o_ref: (TM, TE)      output tile
    acc = jnp.dot(x_ref[...], w_ref[...], preferred_element_type=jnp.float32)
    o_ref[...] = (acc + b_ref[...]).astype(o_ref.dtype)


_BUDGET_BYTES = 28 * 1024 * 1024   # double-buffered working set (safe on v7x 64 MiB)
_VMEM_LIMIT = 48 * 1024 * 1024     # scoped VMEM limit (< v7x physical, < v5e/v6e physical)
_TM_CAP = 1024
_LANE = 128


def _working_set(tm, te, k_pad, itemsize):
    # x block + out block double-buffered; weight + bias blocks (conservatively
    # counted double-buffered even though the pipeline fetches them once).
    return (2 * (tm * k_pad + tm * te) + 2 * (k_pad * te + te)) * itemsize


def _choose_tiles(M, K_pad, E, itemsize):
    """Pick (TM, TE, E_pad). Main path: TE == E (full, resident weight)."""
    gran = {4: 8, 2: 16, 1: 32}.get(itemsize, 8)

    def shrink_tm(tm):
        return max(gran, _round_up(tm // 2, gran))

    # --- main path: full-E resident weight, 1 E-tile -------------------------
    TE, E_pad = E, E
    TM = min(_TM_CAP, _round_up(M, gran))
    while _working_set(TM, TE, K_pad, itemsize) > _BUDGET_BYTES and TM > gran:
        TM = shrink_tm(TM)
    if _working_set(TM, TE, K_pad, itemsize) <= _BUDGET_BYTES:
        return TM, TE, E_pad

    # --- huge-E fallback: tile E (outer grid axis), weight tile stays resident
    # across the whole inner M sweep.
    E_pad = _round_up(E, _LANE)
    TE = min(512, E_pad)
    TE -= TE % _LANE
    while TE > _LANE and (E_pad % TE != 0 or
                          _working_set(gran, TE, K_pad, itemsize) > _BUDGET_BYTES):
        TE -= _LANE
    TE = max(TE, _LANE)
    TM = min(_TM_CAP, _round_up(M, gran))
    while _working_set(TM, TE, K_pad, itemsize) > _BUDGET_BYTES and TM > gran:
        TM = shrink_tm(TM)
    return TM, TE, E_pad


@functools.partial(jax.jit, static_argnames=("patch_size",))
def _patch_embedding_core(x, weight, bias, patch_size):
    B, C, H, W = x.shape
    E = weight.shape[0]
    p = patch_size
    hP, wP = H // p, W // p
    N = hP * wP
    K = C * p * p
    M = B * N

    itemsize = jnp.dtype(x.dtype).itemsize
    K_pad = _round_up(K, _LANE)

    # Match Conv2d(stride=kernel) VALID behaviour if H/W are not divisible by p.
    if H != hP * p or W != wP * p:
        x = x[:, :, :hP * p, :wP * p]

    # Patchify NCHW -> (M, K), c-major per patch to match Conv2d's (c, kh, kw)
    # reduction order. allow_input_fusion lets XLA fold this layout change (and
    # the K zero-pad) into the Pallas input DMA instead of materializing a
    # separate copy in HBM.
    xp = x.reshape(B, C, hP, p, wP, p)
    xp = jnp.transpose(xp, (0, 2, 4, 1, 3, 5)).reshape(M, K)   # (M, K)

    # Conv2d weight (E, C, p, p) -> dense (K, E); bias -> f32 row vector.
    w2d = weight.reshape(E, K).T                                # (K, E)
    b2d = bias.astype(jnp.float32).reshape(1, E)                # (1, E)

    if K_pad != K:
        # Zero rows of the weight -> contributes 0; keeps MXU passes aligned.
        xp = jnp.pad(xp, ((0, 0), (0, K_pad - K)))
        w2d = jnp.pad(w2d, ((0, K_pad - K), (0, 0)))

    TM, TE, E_pad = _choose_tiles(M, K_pad, E, itemsize)
    if E_pad != E:   # only on the huge-E fallback path
        w2d = jnp.pad(w2d, ((0, 0), (0, E_pad - E)))
        b2d = jnp.pad(b2d, ((0, 0), (0, E_pad - E)))

    nE = E_pad // TE
    nM = pl.cdiv(M, TM)
    # E tiles on the OUTER axis, M tiles inner: the weight/bias index maps are
    # constant across the inner M sweep, so Pallas fetches each weight tile
    # exactly once (and exactly once total on the main path where nE == 1).
    grid = (nE, nM)

    out = pl.pallas_call(
        _patch_embed_kernel,
        out_shape=jax.ShapeDtypeStruct((M, E_pad), x.dtype),
        grid_spec=pltpu.PrefetchScalarGridSpec(
            num_scalar_prefetch=0,
            grid=grid,
            in_specs=[
                pl.BlockSpec((TM, K_pad), lambda j, i: (i, 0)),
                pl.BlockSpec((K_pad, TE), lambda j, i: (0, j)),
                pl.BlockSpec((1, TE), lambda j, i: (0, j)),
            ],
            out_specs=pl.BlockSpec((TM, TE), lambda j, i: (i, j)),
        ),
        compiler_params=pltpu.CompilerParams(
            dimension_semantics=("parallel", "parallel"),
            vmem_limit_bytes=_VMEM_LIMIT,
            allow_input_fusion=[True, False, False],
        ),
        cost_estimate=pl.CostEstimate(
            flops=2 * M * K_pad * E_pad,
            transcendentals=0,
            bytes_accessed=(nE * M * K_pad + K_pad * E_pad + M * E_pad) * itemsize
                           + E_pad * 4,
        ),
    )(xp, w2d, b2d)

    if E_pad != E:   # rare fallback only; main path writes the output once.
        out = out[:, :E]
    return out.reshape(B, N, E)


def patch_embedding(x, weight, bias, patch_size):
    """Forward pass of PatchEmbedding.

    Args:
      x:      (B, C, H, W)  NCHW input image.
      weight: (E, C, p, p)  Conv2d weight (PyTorch layout).
      bias:   (E,)          Conv2d bias.
      patch_size: int p (kernel = stride = p).

    Returns:
      patches:   (B, H//p * W//p, E)
      h_patches: int
      w_patches: int
    """
    _, _, H, W = x.shape
    hP, wP = H // patch_size, W // patch_size
    patches = _patch_embedding_core(x, weight, bias, patch_size)
    return patches, hP, wP


def _reference(x, weight, bias, patch_size):
    # Pure-JAX reference: conv2d with kernel=stride=patch_size, NCHW.
    y = jax.lax.conv_general_dilated(
        x, weight,
        window_strides=(patch_size, patch_size),
        padding="VALID",
        dimension_numbers=("NCHW", "OIHW", "NCHW"),
    ) + bias[None, :, None, None]
    B, E, hP, wP = y.shape
    return jnp.transpose(y, (0, 2, 3, 1)).reshape(B, hP * wP, E), hP, wP


if __name__ == "__main__":
    # Small shapes consistent with the module.
    batch, in_channels, H, W = 2, 4, 16, 16
    patch_size, embed_dim = 8, 32

    key = jax.random.PRNGKey(0)
    kx, kw, kb = jax.random.split(key, 3)

    x = jax.random.normal(kx, (batch, in_channels, H, W), dtype=jnp.float32)

    # Deterministic parameter init (Conv2d-style uniform fan-in bound).
    fan_in = in_channels * patch_size * patch_size
    bound = 1.0 / (fan_in ** 0.5)
    weight = jax.random.uniform(
        kw, (embed_dim, in_channels, patch_size, patch_size),
        minval=-bound, maxval=bound, dtype=jnp.float32)
    bias = jax.random.uniform(
        kb, (embed_dim,), minval=-bound, maxval=bound, dtype=jnp.float32)

    patches, hP, wP = patch_embedding(x, weight, bias, patch_size)
    patches = jax.block_until_ready(patches)

    ref, hP_ref, wP_ref = _reference(x, weight, bias, patch_size)
    assert patches.shape == (batch, hP * wP, embed_dim), patches.shape
    assert (hP, wP) == (hP_ref, wP_ref)
    assert jnp.allclose(patches, ref, atol=1e-4, rtol=1e-4)

    print("KERNEL_OK")
</pallas_src>

<mosaic_0001>
module attributes {stable_mosaic.version = 11 : i64} {
  func.func @_patch_embed_kernel(%arg0: i32, %arg1: i32, %arg2: memref<8x256xf32, #tpu.memory_space<vmem>>, %arg3: memref<256x32xf32, #tpu.memory_space<vmem>>, %arg4: memref<1x32xf32, #tpu.memory_space<vmem>>, %arg5: memref<8x32xf32, #tpu.memory_space<vmem>>) attributes {dimension_semantics = [#tpu.dimension_semantics<parallel>, #tpu.dimension_semantics<parallel>], iteration_bounds = array<i64: 1, 1>, scalar_prefetch = 0 : i64, scratch_operands = 0 : i64, tpu.core_type = #tpu.core_type<tc>, window_params = [{transform_indices = @transform_0, window_bounds = array<i64: 8, 256>}, {transform_indices = @transform_1, window_bounds = array<i64: 256, 32>}, {transform_indices = @transform_2, window_bounds = array<i64: 1, 32>}, {transform_indices = @transform_3, window_bounds = array<i64: 8, 32>}]} {
    %c0 = arith.constant 0 : index
    %c0_0 = arith.constant 0 : index
    %0 = vector.load %arg2[%c0, %c0_0] : memref<8x256xf32, #tpu.memory_space<vmem>>, vector<8x256xf32>
    %c0_1 = arith.constant 0 : index
    %c0_2 = arith.constant 0 : index
    %1 = vector.load %arg3[%c0_1, %c0_2] : memref<256x32xf32, #tpu.memory_space<vmem>>, vector<256x32xf32>
    %cst = arith.constant dense<0.000000e+00> : vector<8x32xf32>
    %2 = tpu.matmul %0, %1, %cst {dimension_numbers = #tpu.dot_dimension_numbers<[1], [0], [0], [1], [0, 0, 1, 1], [], []>} : vector<8x256xf32>, vector<256x32xf32>, vector<8x32xf32> -> vector<8x32xf32>
    %c0_3 = arith.constant 0 : index
    %c0_4 = arith.constant 0 : index
    %3 = vector.load %arg4[%c0_3, %c0_4] : memref<1x32xf32, #tpu.memory_space<vmem>>, vector<1x32xf32>
    %4 = vector.broadcast %3 : vector<1x32xf32> to vector<8x32xf32>
    %5 = arith.addf %2, %4 : vector<8x32xf32>
    %c0_5 = arith.constant 0 : index
    %c0_6 = arith.constant 0 : index
    %6 = vector.load %arg5[%c0_5, %c0_6] : memref<8x32xf32, #tpu.memory_space<vmem>>, vector<8x32xf32>
    tpu.vector_store %arg5[%c0_5, %c0_6], %5 {strides = array<i32>} : memref<8x32xf32, #tpu.memory_space<vmem>>, vector<8x32xf32>,
    return
  }
  func.func @transform_0(%arg0: i32, %arg1: i32) -> (i32, i32) {
    %c0_i32 = arith.constant 0 : i32
    %c0_i32_0 = arith.constant 0 : i32
    return %arg1, %c0_i32 : i32, i32
  }
  func.func @transform_1(%arg0: i32, %arg1: i32) -> (i32, i32) {
    %c0_i32 = arith.constant 0 : i32
    %c0_i32_0 = arith.constant 0 : i32
    return %c0_i32, %arg0 : i32, i32
  }
  func.func @transform_2(%arg0: i32, %arg1: i32) -> (i32, i32) {
    %c0_i32 = arith.constant 0 : i32
    %c0_i32_0 = arith.constant 0 : i32
    return %c0_i32, %arg0 : i32, i32
  }
  func.func @transform_3(%arg0: i32, %arg1: i32) -> (i32, i32) {
    %c0_i32 = arith.constant 0 : i32
    return %arg1, %arg0 : i32, i32
  }
}

</mosaic_0001>

<bundles_post_ra>
// kernel: _patch_embedding_core.1
= control target key start
LH: loop header
LB: loop body
LE: loop exit
PB: predicated region body
PF: predicated region fallthrough
CT: control target
= control target key end

     0   :  { %s373_s0 = inlined_call_operand.vmem [shape: f32[8,256], index: 0, kind: input, shape index: {}]   ;;  %s374_s1 = inlined_call_operand.vmem [shape: f32[256,32], index: 1, kind: input, shape index: {}]   ;;  %s375_s2 = inlined_call_operand.vmem [shape: f32[1,32], index: 2, kind: input, shape index: {}]   ;;  %s376_s3 = inlined_call_operand.hbm [shape: f32[8,32], index: 3, kind: output, shape index: {}]  }
   0x1   :  { %v33_v0 = vld [vmem:[%s374_s1 + $0x80] sm:$0xff]  ;;  %v34_v1 = vld [vmem:[%s374_s1 + $0x88] sm:$0xff]  ;;  %v35_v5 = vld [vmem:[%s374_s1 + $0x90] sm:$0xff] }
   0x2   :  { %v17_v2 = vld [vmem:[%s374_s1] sm:$0xff]  ;;  %v178_v3 = vpack.c.bf16 %v34_v1, %v33_v0  ;;  %v18_v4 = vld [vmem:[%s374_s1 + $0x8] sm:$0xff]  ;;  %v36_v6 = vld [vmem:[%s374_s1 + $0x98] sm:$0xff] }
   0x3   :  { %v180_v7 = vpack.c.bf16 %v18_v4, %v17_v2  ;;  %v182_v8 = vpack.c.bf16 %v36_v6, %v35_v5  ;;  %v19_v9 = vld [vmem:[%s374_s1 + $0x10] sm:$0xff]  ;;  %v20_v10 = vld [vmem:[%s374_s1 + $0x18] sm:$0xff]  ;;  %v37_v11 = vld [vmem:[%s374_s1 + $0xa0] sm:$0xff] }
   0x4   :  { %179 = vmatprep.subr.bf16.mxu0 %v178_v3  ;;  %v38_v12 = vld [vmem:[%s374_s1 + $0xa8] sm:$0xff]  ;;  %v184_v13 = vpack.c.bf16 %v20_v10, %v19_v9  ;;  %v21_v15 = vld [vmem:[%s374_s1 + $0x20] sm:$0xff]  ;;  %v39_v17 = vld [vmem:[%s374_s1 + $0xb0] sm:$0xff] }
   0x5   :  { %181 = vmatpush3.bf16.msra.mxu0 %v180_v7  ;;  %v186_v14 = vpack.c.bf16 %v38_v12, %v37_v11  ;;  %v22_v16 = vld [vmem:[%s374_s1 + $0x28] sm:$0xff]  ;;  %v40_v18 = vld [vmem:[%s374_s1 + $0xb8] sm:$0xff]  ;;  %v23_v21 = vld [vmem:[%s374_s1 + $0x30] sm:$0xff] }
   0x6   :  { %183 = vmatprep.subr.bf16.mxu0 %v182_v8  ;;  %v188_v19 = vpack.c.bf16 %v22_v16, %v21_v15  ;;  %v190_v20 = vpack.c.bf16 %v40_v18, %v39_v17  ;;  %v24_v22 = vld [vmem:[%s374_s1 + $0x38] sm:$0xff]  ;;  %v41_v23 = vld [vmem:[%s374_s1 + $0xc0] sm:$0xff]  ;;  %v42_v24 = vld [vmem:[%s374_s1 + $0xc8] sm:$0xff] }
   0x7   :  { %v16_v25 = vld [vmem:[%s373_s0 + $0x8] sm:$0xff] }
   0x8   :  { %120 = vmatprep.mubr.f32.mxu0 %v16_v25 }
   0x9   :  { %185 = vmatpush3.bf16.msra.mxu0 %v184_v13 }
   0xa   :  { %187 = vmatprep.subr.bf16.mxu0 %v186_v14 }
   0xb   :  { %8 = vsyncpa [#allocation3], 0  ;;  %v192_v26 = vpack.c.bf16 %v24_v22, %v23_v21  ;;  %v194_v27 = vpack.c.bf16 %v42_v24, %v41_v23  ;;  %v25_v28 = vld [vmem:[%s374_s1 + $0x40] sm:$0xff]  ;;  %v26_v29 = vld [vmem:[%s374_s1 + $0x48] sm:$0xff]  ;;  %s235_s28 = smov [#allocation2]   ;;  %vm126_vm0 = vcmask 261120  }
   0xc   :  { %v43_v30 = vld [vmem:[%s374_s1 + $0xd0] sm:$0xff]  ;;  %v44_v31 = vld [vmem:[%s374_s1 + $0xd8] sm:$0xff]  ;;  %v196_v32 = vpack.c.bf16 %v26_v29, %v25_v28  ;;  %v45_v36 = vld [vmem:[%s374_s1 + $0xe0] sm:$0xff]  ;;  %s134_s29 = sshll.u32 %s235_s28, 4  ;;  %s135_s29 = int_to_ptr.vmem [resolvable:$true] %s134_s29 }
   0xd   :  { %189 = vmatpush3.bf16.msra.mxu0 %v188_v19  ;;  %v198_v33 = vpack.c.bf16 %v44_v31, %v43_v30  ;;  %v27_v34 = vld [vmem:[%s374_s1 + $0x50] sm:$0xff]  ;;  %v28_v35 = vld [vmem:[%s374_s1 + $0x58] sm:$0xff]  ;;  %v46_v37 = vld [vmem:[%s374_s1 + $0xe8] sm:$0xff]  ;;  %p216_p1 = scmp.lt.s32.totalorder %s135_s29, %s135_s29 }
   0xe   :  { %191 = vmatprep.subr.bf16.mxu0 %v190_v20  ;;  %v200_v38 = vpack.c.bf16 %v28_v35, %v27_v34  ;;  %v202_v39 = vpack.c.bf16 %v46_v37, %v45_v36  ;;  %v29_v40 = vld [vmem:[%s374_s1 + $0x60] sm:$0xff]  ;;  %v30_v41 = vld [vmem:[%s374_s1 + $0x68] sm:$0xff]  ;;  %v47_v42 = vld [vmem:[%s374_s1 + $0xf0] sm:$0xff] }
   0xf   :  { %v48_v43 = vld [vmem:[%s374_s1 + $0xf8] sm:$0xff]  ;;  %v204_v44 = vpack.c.bf16 %v30_v41, %v29_v40  ;;  %v31_v46 = vld [vmem:[%s374_s1 + $0x70] sm:$0xff]  ;;  %v15_v49 = vld [vmem:[%s373_s0] sm:$0xff] }
  0x10   :  { %v206_v45 = vpack.c.bf16 %v48_v43, %v47_v42  ;;  %v32_v47 = vld [vmem:[%s374_s1 + $0x78] sm:$0xff]  ;;  %v142_v51 = vld [vmem:[%s375_s2] ss:$0 sm:$0xff]  ;;  %s211_s1 = scalar_lea.vmem %s135_s29, 128 }
  0x11   :  { %193 = vmatpush3.bf16.msra.mxu0 %v192_v26  ;;  %v208_v48 = vpack.c.bf16 %v32_v47, %v31_v46  ;;  %p212_p0 = scmp.ne.s32.totalorder %s135_s29, %s211_s1  ;;  %p217_p2 = scmp.lt.s32.totalorder %s211_s1, %s211_s1 }
  0x12   :  { %195 = vmatprep.subr.bf16.mxu0 %v194_v27 }
  0x13   :  { %p218_p3 = por %p217_p2, %p216_p1 }
  0x15   :  { %197 = vmatpush3.bf16.msra.mxu0 %v196_v32  ;;  %p219_p4 = pnand %p218_p3, %p212_p0 }
  0x16   :  { %199 = vmatprep.subr.bf16.mxu0 %v198_v33 }
  0x19   :  { %201 = vmatpush3.bf16.msra.mxu0 %v200_v38 }
  0x1a   :  { %203 = vmatprep.subr.bf16.mxu0 %v202_v39 }
  0x1d   :  { %205 = vmatpush3.bf16.msra.mxu0 %v204_v44 }
  0x1e   :  { %207 = vmatprep.subr.bf16.mxu0 %v206_v45 }
  0x21   :  { %209 = vmatpush3.bf16.msra.mxu0 %v208_v48 }
  0x24   :  { %121 = vmatmul.mubr.f32.vlgmr.msra.gmra.mrb[0].mxu0 %v15_v49 }
  0xf7   :  { %v175_v50 = vpop.f32.mrb[0].mxu0 }
  0xf8   :  { %v176_v52 = vpop.f32.mrb[1].mxu0 }
  0xf9   :  { %v177_v53 = vadd.f32 %v176_v52, %v175_v50 }
  0xfb   :  { %v123_v54 = vadd.f32 %v177_v53, %v142_v51 }
  0xfd   :  { %127 = vst.msk [vmem:[#allocation2] sm:$0xff] %vm126_vm0, %v123_v54 }
  0xfe   :  { %222 = shalt.err (!%p219_p4)
}
  0xff   :  { %s223_s4 = scalar_lea.hbm %s376_s3, 128 }
 0x100   :  { %p224_p5 = scmp.ne.s32.totalorder %s376_s3, %s223_s4  ;;  %p227_p6 = scmp.lt.u32.totalorder %s223_s4, %s376_s3 }
 0x102   :  { %p229_p7 = pnand %p227_p6, %p224_p5 }
 0x104   :  { %232 = shalt.err (!%p229_p7)
}
 0x105   :  { %137 = dma.vmem_to_hbm [thread:$0]  %s135_s29, 128, %s376_s3, [#allocation3]  }
 0x106   :  { %233 = dma.done.wait [#allocation3], 128  }
 0x107   :  { %234 = vsyncadd [#allocation3], 4294967168 }
 0x108   :  { %141 = vsyncpa [#allocation3], 1 }

</bundles_post_ra>
